<compile_context>
chip_gen: v5e
topology: v5e:2x2
jax: 0.10.0
libtpu: 0.0.40
codegen_flags: <defaults>
</compile_context>

<pallas_src>
import math

import jax
import jax.numpy as jnp
from jax.experimental import pallas as pl
from jax.experimental.pallas import tpu as pltpu


def bert_intermediate_kernel(x_ref, w_ref, b_ref, o_ref):
    # x_ref: (TM, H) activation storage dtype
    # w_ref: (H, TN) compute dtype (bf16 by default)
    # b_ref: (1, TN) f32
    # o_ref: (TM, TN) output storage dtype
    x = x_ref[...].astype(w_ref.dtype)  # cheap VPU cast; MXU sees matched operand dtypes
    y = jnp.dot(x, w_ref[...], preferred_element_type=jnp.float32)
    y = y + b_ref[...].astype(jnp.float32)

    # Exact (erf-based) GELU matching PyTorch, constants folded:
    #   gelu(y) = y * (0.5 + 0.5 * erf(y / sqrt(2)))
    inv_sqrt2 = jnp.float32(0.7071067811865476)
    act = y * (0.5 + 0.5 * jax.lax.erf(y * inv_sqrt2))

    o_ref[...] = act.astype(o_ref.dtype)


def _round_up(x, m):
    return ((x + m - 1) // m) * m


def bert_intermediate(hidden_states, weight, bias, *, tile_m=1024, tile_n=512,
                      compute_dtype=jnp.bfloat16):
    """hidden_states: (B, S, H)  f32 or bf16
       weight:        (H, I)     (already transposed from PyTorch (out, in) layout)
       bias:          (I,)
       compute_dtype: MXU operand dtype (default bf16; None/f32 -> exact f32 matmul)
       returns        (B, S, I)  same dtype as hidden_states
    """
    B, S, H = hidden_states.shape
    I = weight.shape[1]
    M = B * S
    out_dtype = hidden_states.dtype

    # Clamp tiles to the problem size while keeping (8, 128) alignment.
    tile_m = min(tile_m, _round_up(M, 8))
    tile_n = min(tile_n, _round_up(I, 128))
    Ip = _round_up(I, tile_n)

    # Activation: no per-call pad — boundary M tile handled by the cdiv grid.
    x2d = hidden_states.reshape(M, H)

    # Weight/bias prep is shape-static per model (cast + optional pad); in a real model,
    # pre-cast/pre-pad the parameters once outside the per-token path.
    w2d = weight if compute_dtype is None else weight.astype(compute_dtype)
    b2d = bias.reshape(1, I).astype(jnp.float32)
    if Ip != I:
        w2d = jnp.pad(w2d, ((0, 0), (0, Ip - I)))
        b2d = jnp.pad(b2d, ((0, 0), (0, Ip - I)))

    grid = (pl.cdiv(M, tile_m), Ip // tile_n)

    isz_x = jnp.dtype(x2d.dtype).itemsize
    isz_w = jnp.dtype(w2d.dtype).itemsize
    isz_b = jnp.dtype(b2d.dtype).itemsize
    isz_o = jnp.dtype(out_dtype).itemsize

    cost = pl.CostEstimate(
        flops=2 * M * H * Ip,
        transcendentals=M * Ip,  # one erf per output element
        bytes_accessed=(
            M * H * isz_x
            + H * Ip * isz_w * grid[0]  # weight re-streamed once per M tile
            + Ip * isz_b
            + M * Ip * isz_o
        ),
    )

    # Scoped VMEM: double-buffered blocks + f32 intermediate tiles + slack.
    x_blk = tile_m * H * isz_x
    w_blk = H * tile_n * isz_w
    b_blk = tile_n * isz_b
    o_blk = tile_m * tile_n * isz_o
    vmem_needed = 2 * (x_blk + w_blk + b_blk + o_blk) + 2 * tile_m * tile_n * 4
    vmem_limit = int(min(64 * 1024 * 1024, max(vmem_needed + (4 << 20), 16 << 20)))

    out2d = pl.pallas_call(
        bert_intermediate_kernel,
        out_shape=jax.ShapeDtypeStruct((M, Ip), out_dtype),
        grid_spec=pltpu.PrefetchScalarGridSpec(
            num_scalar_prefetch=0,
            grid=grid,
            in_specs=[
                pl.BlockSpec((tile_m, H), lambda i, j: (i, 0)),    # X row tile (full K)
                pl.BlockSpec((H, tile_n), lambda i, j: (0, j)),    # streamed weight cols
                pl.BlockSpec((1, tile_n), lambda i, j: (0, j)),    # bias slice
            ],
            out_specs=pl.BlockSpec((tile_m, tile_n), lambda i, j: (i, j)),
        ),
        compiler_params=pltpu.CompilerParams(
            dimension_semantics=("parallel", "parallel"),
            vmem_limit_bytes=vmem_limit,
        ),
        cost_estimate=cost,
    )(x2d, w2d, b2d)

    if Ip != I:
        out2d = out2d[:, :I]
    return out2d.reshape(B, S, I)


def reference(hidden_states, weight, bias):
    y = jnp.einsum("bsh,hi->bsi", hidden_states.astype(jnp.float32),
                   weight.astype(jnp.float32)) + bias.astype(jnp.float32)
    return y * 0.5 * (1.0 + jax.lax.erf(y / jnp.sqrt(2.0)))


if __name__ == "__main__":
    # Small BERT-like config: hidden=32, intermediate=128, batch=2, seq=8
    B, S, H, I = 2, 8, 32, 128

    key = jax.random.PRNGKey(0)
    kx, kw, kb = jax.random.split(key, 3)

    hidden_states = jax.random.normal(kx, (B, S, H), dtype=jnp.float32)
    # Deterministic parameter init (synthetic; not a checkpoint load)
    weight = jax.random.normal(kw, (H, I), dtype=jnp.float32) * (1.0 / math.sqrt(H))
    bias = jax.random.normal(kb, (I,), dtype=jnp.float32) * 0.01

    ref = jax.block_until_ready(reference(hidden_states, weight, bias))

    # 1) Exact f32 path (matches PyTorch erf-GELU numerics tightly).
    out_f32 = jax.block_until_ready(
        bert_intermediate(hidden_states, weight, bias, compute_dtype=None))
    assert out_f32.shape == (B, S, I)
    assert jnp.allclose(out_f32, ref, atol=1e-5, rtol=1e-5)

    # 2) Default bf16 MXU-operand path (f32 accumulation) — relaxed tolerance.
    out_bf16 = jax.block_until_ready(bert_intermediate(hidden_states, weight, bias))
    assert out_bf16.shape == (B, S, I)
    assert jnp.allclose(out_bf16, ref, atol=3e-2, rtol=3e-2)

    # 3) Tile-unaligned M (cdiv boundary block, no activation padding), exact path.
    B2, S2 = 3, 7
    hs2 = jax.random.normal(kx, (B2, S2, H), dtype=jnp.float32)
    out2 = jax.block_until_ready(
        bert_intermediate(hs2, weight, bias, tile_m=8, tile_n=128, compute_dtype=None))
    ref2 = jax.block_until_ready(reference(hs2, weight, bias))
    assert out2.shape == (B2, S2, I)
    assert jnp.allclose(out2, ref2, atol=1e-5, rtol=1e-5)

    print("KERNEL_OK")
</pallas_src>

<mosaic_0001>
module attributes {stable_mosaic.version = 11 : i64} {
  func.func @bert_intermediate_kernel(%arg0: i32, %arg1: i32, %arg2: memref<16x32xf32, #tpu.memory_space<vmem>>, %arg3: memref<32x128xf32, #tpu.memory_space<vmem>>, %arg4: memref<1x128xf32, #tpu.memory_space<vmem>>, %arg5: memref<16x128xf32, #tpu.memory_space<vmem>>) attributes {dimension_semantics = [#tpu.dimension_semantics<parallel>, #tpu.dimension_semantics<parallel>], iteration_bounds = array<i64: 1, 1>, scalar_prefetch = 0 : i64, scratch_operands = 0 : i64, tpu.core_type = #tpu.core_type<tc>, window_params = [{transform_indices = @transform_0, window_bounds = array<i64: 16, 32>}, {transform_indices = @transform_1, window_bounds = array<i64: 32, 128>}, {transform_indices = @transform_2, window_bounds = array<i64: 1, 128>}, {transform_indices = @transform_3, window_bounds = array<i64: 16, 128>}]} {
    %c0 = arith.constant 0 : index
    %c0_0 = arith.constant 0 : index
    %0 = vector.load %arg2[%c0, %c0_0] : memref<16x32xf32, #tpu.memory_space<vmem>>, vector<16x32xf32>
    %c0_1 = arith.constant 0 : index
    %c0_2 = arith.constant 0 : index
    %1 = vector.load %arg3[%c0_1, %c0_2] : memref<32x128xf32, #tpu.memory_space<vmem>>, vector<32x128xf32>
    %cst = arith.constant dense<0.000000e+00> : vector<16x128xf32>
    %2 = tpu.matmul %0, %1, %cst {dimension_numbers = #tpu.dot_dimension_numbers<[1], [0], [0], [1], [0, 0, 1, 1], [], []>} : vector<16x32xf32>, vector<32x128xf32>, vector<16x128xf32> -> vector<16x128xf32>
    %c0_3 = arith.constant 0 : index
    %c0_4 = arith.constant 0 : index
    %3 = vector.load %arg4[%c0_3, %c0_4] : memref<1x128xf32, #tpu.memory_space<vmem>>, vector<1x128xf32>
    %4 = vector.broadcast %3 : vector<1x128xf32> to vector<16x128xf32>
    %5 = arith.addf %2, %4 : vector<16x128xf32>
    %cst_5 = arith.constant 0.707106769 : f32
    %6 = vector.broadcast %cst_5 : f32 to vector<16x128xf32>
    %7 = arith.mulf %5, %6 : vector<16x128xf32>
    %8 = math.erf %7 : vector<16x128xf32>
    %cst_6 = arith.constant 5.000000e-01 : f32
    %9 = vector.broadcast %cst_6 : f32 to vector<16x128xf32>
    %10 = arith.mulf %9, %8 : vector<16x128xf32>
    %cst_7 = arith.constant 5.000000e-01 : f32
    %11 = vector.broadcast %cst_7 : f32 to vector<16x128xf32>
    %12 = arith.addf %11, %10 : vector<16x128xf32>
    %13 = arith.mulf %5, %12 : vector<16x128xf32>
    %c0_8 = arith.constant 0 : index
    %c0_9 = arith.constant 0 : index
    %14 = vector.load %arg5[%c0_8, %c0_9] : memref<16x128xf32, #tpu.memory_space<vmem>>, vector<16x128xf32>
    tpu.vector_store %arg5[%c0_8, %c0_9], %13 {strides = array<i32>} : memref<16x128xf32, #tpu.memory_space<vmem>>, vector<16x128xf32>,
    return
  }
  func.func @transform_0(%arg0: i32, %arg1: i32) -> (i32, i32) {
    %c0_i32 = arith.constant 0 : i32
    %c0_i32_0 = arith.constant 0 : i32
    return %arg0, %c0_i32 : i32, i32
  }
  func.func @transform_1(%arg0: i32, %arg1: i32) -> (i32, i32) {
    %c0_i32 = arith.constant 0 : i32
    %c0_i32_0 = arith.constant 0 : i32
    return %c0_i32, %arg1 : i32, i32
  }
  func.func @transform_2(%arg0: i32, %arg1: i32) -> (i32, i32) {
    %c0_i32 = arith.constant 0 : i32
    %c0_i32_0 = arith.constant 0 : i32
    return %c0_i32, %arg1 : i32, i32
  }
  func.func @transform_3(%arg0: i32, %arg1: i32) -> (i32, i32) {
    %c0_i32 = arith.constant 0 : i32
    return %arg0, %arg1 : i32, i32
  }
}

</mosaic_0001>

<bundles_post_ra>
// kernel: tpu_custom_call.1
= control target key start
LH: loop header
LB: loop body
LE: loop exit
PB: predicated region body
PF: predicated region fallthrough
CT: control target
= control target key end

     0   :  { %8 = vsyncpa [#allocation3], 0  ;;  %s357_s0 = inlined_call_operand.hbm [shape: f32[16,32], index: 0, kind: input, shape index: {}]   ;;  %s358_s1 = inlined_call_operand.hbm [shape: f32[32,128], index: 1, kind: input, shape index: {}]   ;;  %s359_s2 = inlined_call_operand.vmem [shape: f32[1,128], index: 2, kind: input, shape index: {}]   ;;  %s360_s3 = inlined_call_operand.hbm [shape: f32[16,128], index: 3, kind: output, shape index: {}]  }
   0x1   :  { %9 = vsyncpa [#allocation6], 0 }
   0x2   :  { %10 = vsyncpa [#allocation4], 0  ;;  %s15_s14 = sshll.u32 %s357_s0, 4  ;;  %s293_s15 = smov [#allocation2]   ;;  %s16_s14 = int_to_ptr.hbm [resolvable:$true] %s15_s14 }
   0x3   :  { %s17_s16 = sshll.u32 %s293_s15, 4  ;;  %s28_s19 = sshll.u32 %s358_s1, 4  ;;  %s18_s16 = int_to_ptr.vmem [resolvable:$true] %s17_s16  ;;  %s29_s19 = int_to_ptr.hbm [resolvable:$true] %s28_s19 }
   0x4   :  { %s294_s20 = smov 128   ;;  %s295_s21 = smov 8  }
   0x5   :  { %23 = dma.hbm_to_vmem [thread:$0]  %s16_s14, 256, %s18_s16, [#allocation3], %s294_s20, %s294_s20, %s295_s21  }
   0x6   :  { %s296_s22 = smov [#allocation5]  }
   0x7   :  { %s30_s23 = sshll.u32 %s296_s22, 4  ;;  %s31_s23 = int_to_ptr.vmem [resolvable:$true] %s30_s23 }
   0x8   :  { %36 = dma.hbm_to_vmem [thread:$0]  %s29_s19, 512, %s31_s23, [#allocation6], %s294_s20, %s294_s20, %s295_s21  }
   0x9   :  { %287 = dma.done.wait [#allocation3], 256  }
   0xa   :  { %288 = vsyncadd [#allocation3], 4294967040 }
   0xb   :  { %289 = dma.done.wait [#allocation6], 512  }
   0xc   :  { %290 = vsyncadd [#allocation6], 4294966784  ;;  %v52_v0 = vld [vmem:[#allocation5 + $0x18] sm:$0xff]  ;;  %v51_v1 = vld [vmem:[#allocation5 + $0x10] sm:$0xff]  ;;  %vm57_vm0 = vcmask 261120   ;;  %s183_s27 = sshll.u32 %s360_s3, 4  ;;  %s184_s27 = int_to_ptr.hbm [resolvable:$true] %s183_s27 }
   0xd   :  { %76 = vmatpush.msra.mxu0 %v52_v0  ;;  %201 = vmatpush.msra.mxu1 %v52_v0  ;;  %v50_v2 = vld [vmem:[#allocation5 + $0x8] sm:$0xff]  ;;  %v49_v3 = vld [vmem:[#allocation5] sm:$0xff]  ;;  %v47_v4 = vld [vmem:[#allocation2] sm:$0xff] }
   0xe   :  { %v48_v5 = vld [vmem:[#allocation2 + $0x8] sm:$0xff]  ;;  %v210_v6 = vld [vmem:[%s359_s2] ss:$0 sm:$0xff]  ;;  %s297_s2 = smov [#allocation7]  }
   0xf   :  { %77 = vmatpush.msra.mxu0 %v51_v1  ;;  %202 = vmatpush.msra.mxu1 %v51_v1  ;;  %s181_s24 = sshll.u32 %s297_s2, 4  ;;  %s182_s24 = int_to_ptr.vmem [resolvable:$true] %s181_s24 }
  0x11   :  { %78 = vmatpush.msra.mxu0 %v50_v2  ;;  %203 = vmatpush.msra.mxu1 %v50_v2 }
  0x13   :  { %79 = vmatpush.msra.mxu0 %v49_v3  ;;  %204 = vmatpush.msra.mxu1 %v49_v3 }
  0x14   :  { %197 = vmatmul.msk.f32.vlgmr.msra.gmra.mxu0 %vm57_vm0, %v47_v4  ;;  %198 = vmatmul.msk.f32.vlgmr.msra.gmra.mxu1 %vm57_vm0, %v48_v5 }
  0x91   :  { %v81_v7 = vpop.f32.mrf.mxu0  ;;  %v84_v8 = vpop.f32.mrf.mxu1 }
  0x92   :  { %v333_v9 = vadd.f32 %v210_v6, %v81_v7  ;;  %v335_v10 = vadd.f32 %v210_v6, %v84_v8 }
  0x94   :  { %v338_v11 = vmul.f32 0.70710677, %v333_v9  ;;  %v341_v12 = vmul.f32 0.70710677, %v335_v10 }
  0x96   :  { %v89_v13 = vmul.f32 %v338_v11, %v338_v11  ;;  %v129_v14 = vmul.f32 %v341_v12, %v341_v12 }
  0x98   :  { %v90_v15 = vmin.f32 %v89_v13, 16.0  ;;  %v130_v16 = vmin.f32 %v129_v14, 16.0 }
  0x9a   :  { %v91_v17 = vmul.f32 2.1237322e-06, %v90_v15  ;;  %v102_v18 = vmul.f32 3.8918573e-05, %v90_v15  ;;  %v131_v19 = vmul.f32 2.1237322e-06, %v130_v16 }
  0x9b   :  { %v142_v20 = vmul.f32 3.8918573e-05, %v130_v16 }
  0x9c   :  { %v92_v21 = vadd.f32 0.00028619796, %v91_v17  ;;  %v103_v22 = vadd.f32 0.001143296, %v102_v18  ;;  %v132_v23 = vadd.f32 0.00028619796, %v131_v19 }
  0x9d   :  { %v143_v24 = vadd.f32 0.001143296, %v142_v20 }
  0x9e   :  { %v93_v25 = vmul.f32 %v92_v21, %v90_v15  ;;  %v104_v26 = vmul.f32 %v103_v22, %v90_v15  ;;  %v133_v27 = vmul.f32 %v132_v23, %v130_v16 }
  0x9f   :  { %v144_v28 = vmul.f32 %v143_v24, %v130_v16 }
  0xa0   :  { %v94_v29 = vadd.f32 0.0036580483, %v93_v25  ;;  %v105_v30 = vadd.f32 0.014752088, %v104_v26  ;;  %v134_v33 = vadd.f32 0.0036580483, %v133_v27 }
  0xa1   :  { %v145_v31 = vadd.f32 0.014752088, %v144_v28 }
  0xa2   :  { %v106_v32 = vmul.f32 %v105_v30, %v90_v15  ;;  %v95_v35 = vmul.f32 %v94_v29, %v90_v15  ;;  %v135_v39 = vmul.f32 %v134_v33, %v130_v16 }
  0xa3   :  { %v146_v34 = vmul.f32 %v145_v31, %v130_v16 }
  0xa4   :  { %v107_v36 = vadd.f32 0.112945676, %v106_v32  ;;  %v96_v41 = vadd.f32 0.05243302, %v95_v35  ;;  %v136_v45 = vadd.f32 0.05243302, %v135_v39 }
  0xa5   :  { %v147_v37 = vadd.f32 0.112945676, %v146_v34 }
  0xa6   :  { %v108_v38 = vmul.f32 %v107_v36, %v90_v15  ;;  %v97_v47 = vmul.f32 %v96_v41, %v90_v15  ;;  %v137_v50 = vmul.f32 %v136_v45, %v130_v16 }
  0xa7   :  { %v148_v40 = vmul.f32 %v147_v37, %v130_v16 }
  0xa8   :  { %v109_v42 = vadd.f32 0.4994258, %v108_v38  ;;  %v98_v51 = vadd.f32 0.18741608, %v97_v47  ;;  %v138_v52 = vadd.f32 0.18741608, %v137_v50 }
  0xa9   :  { %v149_v43 = vadd.f32 0.4994258, %v148_v40 }
  0xaa   :  { %v110_v44 = vmul.f32 %v109_v42, %v90_v15  ;;  %v99_v54 = vmul.f32 %v98_v51, %v90_v15  ;;  %v139_v57 = vmul.f32 %v138_v52, %v130_v16 }
  0xab   :  { %v150_v46 = vmul.f32 %v149_v43, %v130_v16 }
  0xac   :  { %v111_v48 = vadd.f32 1.0, %v110_v44  ;;  %v100_v60 = vadd.f32 1.1283791, %v99_v54  ;;  %v140_v2 = vadd.f32 1.1283791, %v139_v57 }
  0xad   :  { %v151_v49 = vadd.f32 1.0, %v150_v46 }
  0xae   :  { %211 = vrcp.f32 %v111_v48  ;;  %v123_v61 = vand.u32 2147483648, %v111_v48  ;;  %v121_v0 = vand.u32 2147483647, %v111_v48  ;;  %vm117_vm3 = vweird.f32 %v111_v48 }
  0xaf   :  { %213 = vrcp.f32 %v151_v49  ;;  %v163_v1 = vand.u32 2147483648, %v151_v49  ;;  %v161_v4 = vand.u32 2147483647, %v151_v49  ;;  %vm157_vm5 = vweird.f32 %v151_v49 }
  0xb0   :  { %v124_v6 = vor.u32 1.1754944e-38, %v123_v61  ;;  %v101_v8 = vmul.f32 %v100_v60, %v338_v11  ;;  %vm122_vm6 = vcmp.eq.f32.partialorder %v121_v0, 8.507059e+37  ;;  %v141_v16 = vmul.f32 %v140_v2, %v341_v12 }
  0xb1   :  { %v164_v14 = vor.u32 1.1754944e-38, %v163_v1  ;;  %vm162_vm8 = vcmp.eq.f32.partialorder %v161_v4, 8.507059e+37 }
  0xb4   :  { %v212_v53 = vpop.eup %211 }
  0xb5   :  { %v214_v55 = vpop.eup %213  ;;  %v113_v56 = vmul.f32 %v212_v53, %v111_v48  ;;  %vm118_vm1 = vweird.f32 %v212_v53 }
  0xb6   :  { %v153_v58 = vmul.f32 %v214_v55, %v151_v49  ;;  %vm158_vm2 = vweird.f32 %v214_v55  ;;  %vm119_vm4 = vmor %vm117_vm3, %vm118_vm1 }
  0xb7   :  { %v114_v59 = vsub.f32 1.0, %v113_v56  ;;  %vm159_vm7 = vmor %vm157_vm5, %vm158_vm2 }
  0xb8   :  { %v154_v62 = vsub.f32 1.0, %v153_v58 }
  0xb9   :  { %v115_v63 = vmul.f32 %v212_v53, %v114_v59 }
  0xba   :  { %v155_v3 = vmul.f32 %v214_v55, %v154_v62 }
  0xbb   :  { %v116_v5 = vadd.f32 %v212_v53, %v115_v63 }
  0xbc   :  { %v156_v7 = vadd.f32 %v214_v55, %v155_v3 }
  0xbd   :  { %v120_v13 = vsel %vm119_vm4, %v212_v53, %v116_v5 }
  0xbe   :  { %v125_v15 = vsel %vm122_vm6, %v124_v6, %v120_v13  ;;  %v160_v17 = vsel %vm159_vm7, %v214_v55, %v156_v7 }
  0xbf   :  { %v126_v18 = vmul.f32 %v125_v15, %v101_v8  ;;  %v165_v19 = vsel %vm162_vm8, %v164_v14, %v160_v17 }
  0xc0   :  { %v166_v20 = vmul.f32 %v165_v19, %v141_v16 }
  0xc1   :  { %v199_v21 = vclamps-f32 %v126_v18, 1.0 }
  0xc2   :  { %v200_v22 = vclamps-f32 %v166_v20, 1.0 }
  0xc3   :  { %v169_v23 = vmul.f32 0.5, %v199_v21 }
  0xc4   :  { %v170_v24 = vmul.f32 0.5, %v200_v22 }
  0xc5   :  { %v171_v25 = vadd.f32 0.5, %v169_v23 }
  0xc6   :  { %v172_v11 = vadd.f32 0.5, %v170_v24 }
  0xc7   :  { %v173_v26 = vmul.f32 %v171_v25, %v333_v9 }
  0xc8   :  { %v174_v12 = vmul.f32 %v172_v11, %v335_v10 }
  0xc9   :  { %175 = vst [vmem:[#allocation7] sm:$0xff] %v173_v26 }
  0xca   :  { %176 = vst [vmem:[#allocation7 + $0x8] sm:$0xff] %v174_v12 }
  0xcb   :  { %189 = dma.vmem_to_hbm [thread:$0]  %s182_s24, 256, %s184_s27, [#allocation4], %s294_s20, %s294_s20, %s295_s21  }
  0xcc   :  { %291 = dma.done.wait [#allocation4], 256  }
  0xcd   :  { %292 = vsyncadd [#allocation4], 4294967040 }
  0xce   :  { %194 = vsyncpa [#allocation3], 1 }
  0xcf   :  { %195 = vsyncpa [#allocation6], 1 }
  0xd0   :  { %196 = vsyncpa [#allocation4], 1 }

</bundles_post_ra>
